<compile_context>
chip_gen: v5e
topology: v5e:2x2
jax: 0.10.0
libtpu: 0.0.40
codegen_flags: <defaults>
</compile_context>

<pallas_src>
import jax
import jax.numpy as jnp
from jax.experimental import pallas as pl
from jax.experimental.pallas import tpu as pltpu


_BLOCK_BYTES_CAP = 4 * 1024 * 1024       # <= 4 MiB per block (per buffer)
_VMEM_LIMIT_BYTES = 32 * 1024 * 1024     # 2 in + 2 out buffers fit comfortably


def _zero_mul_kernel(x_ref, o_ref):
    # x_ref / o_ref: identically shaped channel-0 tiles (channel dim squeezed
    # away by the BlockSpec).  Single full-tile store, no temporaries.
    o_ref[...] = x_ref[...] * jnp.zeros((), dtype=o_ref.dtype)


def densenet_forward(x):
    """Pallas implementation of DenseNet.forward: returns 0 * x[:, 0]."""
    B, C, H, W = x.shape
    HW = H * W
    itemsize = jnp.dtype(x.dtype).itemsize
    cap_elems = max(1024, _BLOCK_BYTES_CAP // itemsize)

    cost = pl.CostEstimate(flops=B * HW, transcendentals=0,
                           bytes_accessed=2 * B * HW * itemsize)

    if HW % 128 == 0:
        rows = HW // 128
        x_r = x.reshape(B, C, rows, 128)          # free contiguous reshape
        out_shape = jax.ShapeDtypeStruct((B, rows, 128), x.dtype)

        if B * HW <= cap_elems:
            # Tiny input: one grid step, one strided channel-0 DMA over all
            # batches (removes (B-1) x ~0.35 us pipeline steps).
            out = pl.pallas_call(
                _zero_mul_kernel,
                out_shape=out_shape,
                grid=(1,),
                in_specs=[pl.BlockSpec((B, None, rows, 128),
                                       lambda i: (0, 0, 0, 0))],
                out_specs=pl.BlockSpec((B, rows, 128), lambda i: (0, 0, 0)),
                compiler_params=pltpu.CompilerParams(
                    dimension_semantics=("arbitrary",),
                    vmem_limit_bytes=_VMEM_LIMIT_BYTES),
                cost_estimate=cost,
            )(x_r)
            return out.reshape(B, H, W)

        # General sublane-dense path: (batch, row-tile) grid, cdiv tiling.
        cap_rows = max(8, ((cap_elems // 128) // 8) * 8)   # multiple of 8
        r_tile = rows if rows <= cap_rows else cap_rows
        out = pl.pallas_call(
            _zero_mul_kernel,
            out_shape=out_shape,
            grid=(B, pl.cdiv(rows, r_tile)),
            in_specs=[pl.BlockSpec((None, None, r_tile, 128),
                                   lambda b, r: (b, 0, r, 0))],
            out_specs=pl.BlockSpec((None, r_tile, 128),
                                   lambda b, r: (b, r, 0)),
            compiler_params=pltpu.CompilerParams(
                dimension_semantics=("parallel", "parallel"),
                vmem_limit_bytes=_VMEM_LIMIT_BYTES),
            cost_estimate=cost,
        )(x_r)
        return out.reshape(B, H, W)

    # Ragged fallback (HW not a multiple of 128): lane-only layout with cdiv
    # tiling; the trailing partial block is handled by Pallas boundary masking.
    x_r = x.reshape(B, C, 1, HW)
    tile = HW if HW <= cap_elems else (cap_elems // 128) * 128
    out = pl.pallas_call(
        _zero_mul_kernel,
        out_shape=jax.ShapeDtypeStruct((B, 1, HW), x.dtype),
        grid=(B, pl.cdiv(HW, tile)),
        in_specs=[pl.BlockSpec((None, None, 1, tile),
                               lambda b, t: (b, 0, 0, t))],
        out_specs=pl.BlockSpec((None, 1, tile), lambda b, t: (b, 0, t)),
        compiler_params=pltpu.CompilerParams(
            dimension_semantics=("parallel", "parallel"),
            vmem_limit_bytes=_VMEM_LIMIT_BYTES),
        cost_estimate=cost,
    )(x_r)
    return out.reshape(B, H, W)


class DenseNetPallas:
    """Mirror of the PyTorch DenseNet module (num_hid is unused, no params)."""

    def __init__(self, num_hid):
        # Original __init__ creates no parameters; nothing to initialize.
        self.num_hid = num_hid
        self.hid1 = None
        self.hid2 = None

    def __call__(self, x):
        self.hid1 = None
        self.hid2 = None
        return densenet_forward(x)


if __name__ == "__main__":
    key = jax.random.PRNGKey(0)
    B, C, H, W = 2, 4, 16, 16
    x = jax.random.normal(key, (B, C, H, W), dtype=jnp.float32)

    model = DenseNetPallas(num_hid=32)
    out = jax.block_until_ready(model(x))

    # Reference check: 0 * x[:, 0]
    ref = 0.0 * x[:, 0]
    assert out.shape == (B, H, W), out.shape
    assert out.dtype == x.dtype, out.dtype
    assert bool(jnp.allclose(out, ref)), "mismatch vs reference"

    print("KERNEL_OK")
</pallas_src>

<mosaic_0001>
module attributes {stable_mosaic.version = 11 : i64} {
  func.func @_zero_mul_kernel(%arg0: i32, %arg1: memref<2x1x2x128xf32, #tpu.memory_space<vmem>>, %arg2: memref<2x2x128xf32, #tpu.memory_space<vmem>>) attributes {dimension_semantics = [#tpu.dimension_semantics<arbitrary>], iteration_bounds = array<i64: 1>, scalar_prefetch = 0 : i64, scratch_operands = 0 : i64, tpu.core_type = #tpu.core_type<tc>, window_params = [{transform_indices = @transform_0, window_bounds = array<i64: 2, 1, 2, 128>}, {pipeline_mode = #tpu.pipeline_mode<synchronous>, transform_indices = @transform_1, window_bounds = array<i64: 2, 2, 128>}]} {
    %c0 = arith.constant 0 : index
    %c0_0 = arith.constant 0 : index
    %c0_1 = arith.constant 0 : index
    %c0_2 = arith.constant 0 : index
    %0 = vector.load %arg1[%c0, %c0_0, %c0_1, %c0_2] : memref<2x1x2x128xf32, #tpu.memory_space<vmem>>, vector<2x1x2x128xf32>
    %1 = vector.shape_cast %0 : vector<2x1x2x128xf32> to vector<2x2x128xf32>
    %cst = arith.constant 0.000000e+00 : f32
    %2 = vector.broadcast %cst : f32 to vector<2x2x128xf32>
    %3 = arith.mulf %1, %2 : vector<2x2x128xf32>
    %c0_3 = arith.constant 0 : index
    %c0_4 = arith.constant 0 : index
    %c0_5 = arith.constant 0 : index
    %4 = vector.load %arg2[%c0_3, %c0_4, %c0_5] : memref<2x2x128xf32, #tpu.memory_space<vmem>>, vector<2x2x128xf32>
    tpu.vector_store %arg2[%c0_3, %c0_4, %c0_5], %3 {strides = array<i32>} : memref<2x2x128xf32, #tpu.memory_space<vmem>>, vector<2x2x128xf32>,
    return
  }
  func.func @transform_0(%arg0: i32) -> (i32, i32, i32, i32) {
    %c0_i32 = arith.constant 0 : i32
    %c0_i32_0 = arith.constant 0 : i32
    %c0_i32_1 = arith.constant 0 : i32
    %c0_i32_2 = arith.constant 0 : i32
    %c0_i32_3 = arith.constant 0 : i32
    return %c0_i32, %c0_i32_0, %c0_i32_1, %c0_i32_2 : i32, i32, i32, i32
  }
  func.func @transform_1(%arg0: i32) -> (i32, i32, i32) {
    %c0_i32 = arith.constant 0 : i32
    %c0_i32_0 = arith.constant 0 : i32
    %c0_i32_1 = arith.constant 0 : i32
    %c0_i32_2 = arith.constant 0 : i32
    return %c0_i32, %c0_i32_0, %c0_i32_1 : i32, i32, i32
  }
}

</mosaic_0001>

<bundles_post_ra>
// kernel: tpu_custom_call.1
= control target key start
LH: loop header
LB: loop body
LE: loop exit
PB: predicated region body
PF: predicated region fallthrough
CT: control target
= control target key end

     0   :  { %6 = vsyncpa [#allocation3], 0  ;;  %s128_s0 = inlined_call_operand.hbm [shape: f32[2,4,2,128], index: 0, kind: input, shape index: {}]   ;;  %s129_s1 = inlined_call_operand.hbm [shape: f32[2,2,128], index: 1, kind: output, shape index: {}]  }
   0x1   :  { %7 = vsyncpa [#allocation4], 0  ;;  %s12_s8 = sshll.u32 %s128_s0, 4  ;;  %s107_s9 = smov [#allocation2]   ;;  %s13_s8 = int_to_ptr.hbm [resolvable:$true] %s12_s8 }
   0x2   :  { %s14_s10 = sshll.u32 %s107_s9, 4  ;;  %s108_s11 = smov 128   ;;  %s15_s10 = int_to_ptr.vmem [resolvable:$true] %s14_s10 }
   0x3   :  { %s109_s12 = smov 32   ;;  %s110_s13 = smov 2  }
   0x4   :  { %20 = dma.hbm_to_vmem [thread:$0]  %s13_s8, 64, %s15_s10, [#allocation3], %s108_s11, %s109_s12, %s110_s13  }
   0x5   :  { %103 = dma.done.wait [#allocation3], 64  }
   0x6   :  { %104 = vsyncadd [#allocation3], 4294967232  ;;  %s111_s14 = smov [#allocation5]   ;;  %s37_s18 = sshll.u32 %s129_s1, 4  ;;  %v25_v0 = vld [vmem:[#allocation2] sm:$0x3]  ;;  %s38_s18 = int_to_ptr.hbm [resolvable:$true] %s37_s18 }
   0x7   :  { %s35_s15 = sshll.u32 %s111_s14, 4  ;;  %v26_v1 = vld [vmem:[#allocation2 + $0x2] sm:$0x3]  ;;  %v27_v2 = vmul.f32 0.0, %v25_v0  ;;  %s36_s15 = int_to_ptr.vmem [resolvable:$true] %s35_s15 }
   0x8   :  { %v28_v3 = vmul.f32 0.0, %v26_v1 }
   0x9   :  { %29 = vst [vmem:[#allocation5] sm:$0x3] %v27_v2 }
   0xa   :  { %30 = vst [vmem:[#allocation5 + $0x2] sm:$0x3] %v28_v3 }
   0xb   :  { %43 = dma.vmem_to_hbm [thread:$0]  %s36_s15, 64, %s38_s18, [#allocation4], %s109_s12, %s109_s12, %s110_s13  }
   0xc   :  { %105 = dma.done.wait [#allocation4], 64  }
   0xd   :  { %106 = vsyncadd [#allocation4], 4294967232 }
   0xe   :  { %48 = vsyncpa [#allocation3], 1 }
   0xf   :  { %49 = vsyncpa [#allocation4], 1 }

</bundles_post_ra>
